<compile_context>
chip_gen: v7x
topology: tpu7x:2x2x1
jax: 0.10.0
libtpu: 0.0.40
codegen_flags: <defaults>
</compile_context>

<pallas_src>
import functools

import jax
import jax.numpy as jnp
from jax.experimental import pallas as pl
from jax.experimental.pallas import tpu as pltpu


def _round_up(n, m):
    return ((n + m - 1) // m) * m


def mlp_kernel(x_ref, w1_ref, w2_ref, o_ref):
    # Biases are folded into the (padded) weight matrices, so the forward is
    # just: relu(x @ W1) @ W2, both matmuls on the MXU with f32 accumulation.
    h = jnp.maximum(
        jnp.dot(x_ref[...], w1_ref[...], preferred_element_type=jnp.float32),
        0.0,
    )
    o_ref[...] = jnp.dot(
        h, w2_ref[...], preferred_element_type=jnp.float32
    ).astype(o_ref.dtype)


def _fold_and_pad(x, w1, b1, w2, b2):
    """Zero-pad to lane/sublane-friendly shapes and fold both biases.

    Layout (exact, padding lanes are zero and sliced off by the caller):
      x_pad[:, D]     = 1.0            -> multiplies the b1 row of w1_pad
      w1_pad[D, :H]   = b1
      w1_pad[D,  H]   = 1.0            -> hidden lane H is constant 1 after ReLU
      w2_pad[H, :C]   = b2             -> layer-2 bias rides the constant lane
    """
    B, D = x.shape
    H = w1.shape[1]
    C = w2.shape[1]

    Bp = _round_up(max(B, 8), 8)          # f32 sublane multiple
    Dp = _round_up(D + 1, 128)            # lane multiple (+1 ones column)
    Hp = _round_up(H + 1, 128)            # lane multiple (+1 constant lane)
    Cp = _round_up(C, 128)                # lane-dense output

    x_pad = jnp.zeros((Bp, Dp), jnp.float32)
    x_pad = x_pad.at[:B, :D].set(x.astype(jnp.float32))
    x_pad = x_pad.at[:, D].set(1.0)

    w1_pad = jnp.zeros((Dp, Hp), jnp.float32)
    w1_pad = w1_pad.at[:D, :H].set(w1)
    w1_pad = w1_pad.at[D, :H].set(b1.reshape(-1))
    w1_pad = w1_pad.at[D, H].set(1.0)

    w2_pad = jnp.zeros((Hp, Cp), jnp.float32)
    w2_pad = w2_pad.at[:H, :C].set(w2)
    w2_pad = w2_pad.at[H, :C].set(b2.reshape(-1))

    return x_pad, w1_pad, w2_pad, B, C


@functools.partial(jax.jit, static_argnames=("tile_b",))
def multi_class_forward(x, w1, b1, w2, b2, *, tile_b=128):
    """x: [B, D]; w1: [D, H]; b1: [1, H]; w2: [H, C]; b2: [1, C] -> [B, C] f32."""
    x_pad, w1_pad, w2_pad, B, C = _fold_and_pad(x, w1, b1, w2, b2)
    Bp, Dp = x_pad.shape
    Hp = w1_pad.shape[1]
    Cp = w2_pad.shape[1]

    if Bp <= tile_b:
        # Small problem: no grid at all -> no software-pipeline bookkeeping,
        # every operand fully resident in VMEM for a single shot.
        y_pad = pl.pallas_call(
            mlp_kernel,
            out_shape=jax.ShapeDtypeStruct((Bp, Cp), jnp.float32),
            in_specs=[pl.BlockSpec(memory_space=pltpu.MemorySpace.VMEM)] * 3,
            out_specs=pl.BlockSpec(memory_space=pltpu.MemorySpace.VMEM),
        )(x_pad, w1_pad, w2_pad)
    else:
        # Larger batch: tile over batch; weights are grid-invariant blocks
        # (stay resident in VMEM); batch axis is "parallel" for megacore.
        Bp_t = _round_up(Bp, tile_b)
        if Bp_t != Bp:
            x_pad = jnp.zeros((Bp_t, Dp), jnp.float32).at[:Bp].set(x_pad)
            Bp = Bp_t
        y_pad = pl.pallas_call(
            mlp_kernel,
            out_shape=jax.ShapeDtypeStruct((Bp, Cp), jnp.float32),
            grid=(Bp // tile_b,),
            in_specs=[
                pl.BlockSpec((tile_b, Dp), lambda i: (i, 0)),
                pl.BlockSpec((Dp, Hp), lambda i: (0, 0)),
                pl.BlockSpec((Hp, Cp), lambda i: (0, 0)),
            ],
            out_specs=pl.BlockSpec((tile_b, Cp), lambda i: (i, 0)),
            compiler_params=pltpu.CompilerParams(
                dimension_semantics=("parallel",)
            ),
        )(x_pad, w1_pad, w2_pad)

    return y_pad[:B, :C]


def init_params(key, number_inputs, number_hidden, number_output):
    """Deterministic init mimicking nn.Linear's U(-1/sqrt(fan_in), 1/sqrt(fan_in)).
    Weights stored transposed to [in, out] for the kernel."""
    k1, k2, k3, k4 = jax.random.split(key, 4)
    bound1 = 1.0 / jnp.sqrt(number_inputs)
    bound2 = 1.0 / jnp.sqrt(number_hidden)
    w1 = jax.random.uniform(k1, (number_inputs, number_hidden),
                            minval=-bound1, maxval=bound1, dtype=jnp.float32)
    b1 = jax.random.uniform(k2, (1, number_hidden),
                            minval=-bound1, maxval=bound1, dtype=jnp.float32)
    w2 = jax.random.uniform(k3, (number_hidden, number_output),
                            minval=-bound2, maxval=bound2, dtype=jnp.float32)
    b2 = jax.random.uniform(k4, (1, number_output),
                            minval=-bound2, maxval=bound2, dtype=jnp.float32)
    return w1, b1, w2, b2


if __name__ == "__main__":
    number_inputs, number_hidden, number_output = 32, 64, 8
    batch = 8

    key = jax.random.PRNGKey(0)
    kx, kp = jax.random.split(key)
    x = jax.random.normal(kx, (batch, number_inputs), dtype=jnp.float32)
    w1, b1, w2, b2 = init_params(kp, number_inputs, number_hidden, number_output)

    # Small-batch (grid-less) path.
    y = jax.block_until_ready(multi_class_forward(x, w1, b1, w2, b2))
    ref = jnp.maximum(x @ w1 + b1, 0.0) @ w2 + b2
    assert y.shape == (batch, number_output)
    assert jnp.allclose(y, ref, atol=1e-4, rtol=1e-4), "mismatch vs reference (small batch)"

    # Batch-tiled ("parallel" grid) path.
    xb = jax.random.normal(jax.random.PRNGKey(1), (300, number_inputs), dtype=jnp.float32)
    yb = jax.block_until_ready(multi_class_forward(xb, w1, b1, w2, b2))
    refb = jnp.maximum(xb @ w1 + b1, 0.0) @ w2 + b2
    assert yb.shape == (300, number_output)
    assert jnp.allclose(yb, refb, atol=1e-4, rtol=1e-4), "mismatch vs reference (tiled batch)"

    print("KERNEL_OK")
</pallas_src>

<mosaic_0001>
module attributes {stable_mosaic.version = 11 : i64} {
  func.func @mlp_kernel(%arg0: memref<8x128xf32, #tpu.memory_space<vmem>>, %arg1: memref<128x128xf32, #tpu.memory_space<vmem>>, %arg2: memref<128x128xf32, #tpu.memory_space<vmem>>, %arg3: memref<8x128xf32, #tpu.memory_space<vmem>>) attributes {dimension_semantics = [], scalar_prefetch = 0 : i64, scratch_operands = 0 : i64, tpu.core_type = #tpu.core_type<tc>} {
    %c0 = arith.constant 0 : index
    %c0_0 = arith.constant 0 : index
    %0 = vector.load %arg0[%c0, %c0_0] : memref<8x128xf32, #tpu.memory_space<vmem>>, vector<8x128xf32>
    %c0_1 = arith.constant 0 : index
    %c0_2 = arith.constant 0 : index
    %1 = vector.load %arg1[%c0_1, %c0_2] : memref<128x128xf32, #tpu.memory_space<vmem>>, vector<128x128xf32>
    %cst = arith.constant dense<0.000000e+00> : vector<8x128xf32>
    %2 = tpu.matmul %0, %1, %cst {dimension_numbers = #tpu.dot_dimension_numbers<[1], [0], [0], [1], [0, 0, 1, 1], [], []>} : vector<8x128xf32>, vector<128x128xf32>, vector<8x128xf32> -> vector<8x128xf32>
    %cst_3 = arith.constant 0.000000e+00 : f32
    %3 = vector.broadcast %cst_3 : f32 to vector<8x128xf32>
    %4 = arith.maximumf %2, %3 : vector<8x128xf32>
    %c0_4 = arith.constant 0 : index
    %c0_5 = arith.constant 0 : index
    %5 = vector.load %arg2[%c0_4, %c0_5] : memref<128x128xf32, #tpu.memory_space<vmem>>, vector<128x128xf32>
    %cst_6 = arith.constant dense<0.000000e+00> : vector<8x128xf32>
    %6 = tpu.matmul %4, %5, %cst_6 {dimension_numbers = #tpu.dot_dimension_numbers<[1], [0], [0], [1], [0, 0, 1, 1], [], []>} : vector<8x128xf32>, vector<128x128xf32>, vector<8x128xf32> -> vector<8x128xf32>
    %c0_7 = arith.constant 0 : index
    %c0_8 = arith.constant 0 : index
    %7 = vector.load %arg3[%c0_7, %c0_8] : memref<8x128xf32, #tpu.memory_space<vmem>>, vector<8x128xf32>
    tpu.vector_store %arg3[%c0_7, %c0_8], %6 {strides = array<i32>} : memref<8x128xf32, #tpu.memory_space<vmem>>, vector<8x128xf32>,
    return
  }
}

</mosaic_0001>

<bundles_post_ra>
// kernel: multi_class_forward.1
= control target key start
LH: loop header
LB: loop body
LE: loop exit
PB: predicated region body
PF: predicated region fallthrough
CT: control target
= control target key end

     0   :  { %v384_v3 = vmov 0.0|0.0   ;;  %vm385_vm0 = vmmov 0   ;;  %v386_v6 = vmov 0.0   ;;  %s535_s0 = inlined_call_operand.vmem [shape: f32[8,128], index: 0, kind: input, shape index: {}]   ;;  %s536_s1 = inlined_call_operand.vmem [shape: f32[128,128], index: 1, kind: input, shape index: {}]   ;;  %s537_s2 = inlined_call_operand.vmem [shape: f32[128,128], index: 2, kind: input, shape index: {}]   ;;  %s538_s3 = inlined_call_operand.hbm [shape: f32[8,128], index: 3, kind: output, shape index: {}]  }
   0x1   :  { %v16_v0 = vld [vmem:[%s536_s1] sm:$0xff]  ;;  %v17_v1 = vld [vmem:[%s536_s1 + $0x8] sm:$0xff]  ;;  %v18_v2 = vld [vmem:[%s536_s1 + $0x10] sm:$0xff]  ;;  %308 = vmatprep.subr.bf16.mxu0 %v384_v3  ;;  %270 = vmatprep.mubr.msk.f32.mxu0 %vm385_vm0, %v386_v6 }
   0x2   :  { %v309_v4 = vpack.c.bf16 %v17_v1, %v16_v0  ;;  %v19_v5 = vld [vmem:[%s536_s1 + $0x18] sm:$0xff]  ;;  %332 = vmatprep.subr.bf16.mxu1 %v384_v3  ;;  %305 = vmatprep.mubr.msk.f32.mxu1 %vm385_vm0, %v386_v6  ;;  %v20_v8 = vld [vmem:[%s536_s1 + $0x20] sm:$0xff]  ;;  %v21_v9 = vld [vmem:[%s536_s1 + $0x28] sm:$0xff] }
   0x3   :  { %v312_v7 = vpack.c.bf16 %v19_v5, %v18_v2  ;;  %v103_v10 = vld [vmem:[%s537_s2] sm:$0xff]  ;;  %v104_v11 = vld [vmem:[%s537_s2 + $0x8] sm:$0xff]  ;;  %v105_v12 = vld [vmem:[%s537_s2 + $0x10] sm:$0xff]  ;;  %v315_v14 = vpack.c.bf16 %v21_v9, %v20_v8 }
   0x4   :  { %310 = vmatpush3.bf16.msra.mxu0 %v309_v4  ;;  %v106_v13 = vld [vmem:[%s537_s2 + $0x18] sm:$0xff]  ;;  %v333_v15 = vpack.c.bf16 %v104_v11, %v103_v10  ;;  %v22_v16 = vld [vmem:[%s536_s1 + $0x30] sm:$0xff]  ;;  %v107_v19 = vld [vmem:[%s537_s2 + $0x20] sm:$0xff] }
   0x5   :  { %311 = vmatprep.subr.bf16.mxu0 %v384_v3  ;;  %v23_v17 = vld [vmem:[%s536_s1 + $0x38] sm:$0xff]  ;;  %v336_v18 = vpack.c.bf16 %v106_v13, %v105_v12  ;;  %v108_v20 = vld [vmem:[%s537_s2 + $0x28] sm:$0xff] }
   0x6   :  { %334 = vmatpush3.bf16.msra.mxu1 %v333_v15 }
   0x7   :  { %335 = vmatprep.subr.bf16.mxu1 %v384_v3 }
   0x8   :  { %313 = vmatpush3.bf16.msra.mxu0 %v312_v7 }
   0x9   :  { %314 = vmatprep.subr.bf16.mxu0 %v384_v3 }
   0xa   :  { %8 = vsyncpa [#allocation3], 0  ;;  %v318_v21 = vpack.c.bf16 %v23_v17, %v22_v16  ;;  %v24_v22 = vld [vmem:[%s536_s1 + $0x40] sm:$0xff]  ;;  %v25_v23 = vld [vmem:[%s536_s1 + $0x48] sm:$0xff]  ;;  %337 = vmatpush3.bf16.msra.mxu1 %v336_v18  ;;  %v339_v24 = vpack.c.bf16 %v108_v20, %v107_v19  ;;  %s387_s23 = smov [#allocation2]  }
   0xb   :  { %338 = vmatprep.subr.bf16.mxu1 %v384_v3  ;;  %v109_v25 = vld [vmem:[%s537_s2 + $0x30] sm:$0xff]  ;;  %v110_v26 = vld [vmem:[%s537_s2 + $0x38] sm:$0xff]  ;;  %v321_v27 = vpack.c.bf16 %v25_v23, %v24_v22  ;;  %v111_v31 = vld [vmem:[%s537_s2 + $0x40] sm:$0xff] }
   0xc   :  { %316 = vmatpush3.bf16.msra.mxu0 %v315_v14  ;;  %v26_v28 = vld [vmem:[%s536_s1 + $0x50] sm:$0xff]  ;;  %v27_v29 = vld [vmem:[%s536_s1 + $0x58] sm:$0xff]  ;;  %v342_v30 = vpack.c.bf16 %v110_v26, %v109_v25  ;;  %v112_v32 = vld [vmem:[%s537_s2 + $0x48] sm:$0xff] }
   0xd   :  { %317 = vmatprep.subr.bf16.mxu0 %v384_v3  ;;  %v324_v33 = vpack.c.bf16 %v27_v29, %v26_v28  ;;  %v28_v34 = vld [vmem:[%s536_s1 + $0x60] sm:$0xff]  ;;  %v29_v35 = vld [vmem:[%s536_s1 + $0x68] sm:$0xff]  ;;  %v345_v36 = vpack.c.bf16 %v112_v32, %v111_v31  ;;  %v113_v37 = vld [vmem:[%s537_s2 + $0x50] sm:$0xff] }
   0xe   :  { %340 = vmatpush3.bf16.msra.mxu1 %v339_v24  ;;  %v114_v38 = vld [vmem:[%s537_s2 + $0x58] sm:$0xff]  ;;  %v327_v39 = vpack.c.bf16 %v29_v35, %v28_v34  ;;  %v30_v40 = vld [vmem:[%s536_s1 + $0x70] sm:$0xff]  ;;  %v115_v43 = vld [vmem:[%s537_s2 + $0x60] sm:$0xff] }
   0xf   :  { %341 = vmatprep.subr.bf16.mxu1 %v384_v3  ;;  %v31_v41 = vld [vmem:[%s536_s1 + $0x78] sm:$0xff]  ;;  %v348_v42 = vpack.c.bf16 %v114_v38, %v113_v37  ;;  %v116_v44 = vld [vmem:[%s537_s2 + $0x68] sm:$0xff]  ;;  %v15_v47 = vld [vmem:[%s535_s0] sm:$0xff]  ;;  %s196_s0 = sshll.u32 %s387_s23, 4  ;;  %s197_s0 = int_to_ptr.vmem [resolvable:$true] %s196_s0 }
  0x10   :  { %319 = vmatpush3.bf16.msra.mxu0 %v318_v21  ;;  %v330_v45 = vpack.c.bf16 %v31_v41, %v30_v40  ;;  %v351_v46 = vpack.c.bf16 %v116_v44, %v115_v43  ;;  %v117_v48 = vld [vmem:[%s537_s2 + $0x70] sm:$0xff]  ;;  %v118_v49 = vld [vmem:[%s537_s2 + $0x78] sm:$0xff]  ;;  %s360_s24 = scalar_lea.vmem %s197_s0, 128  ;;  %p365_p1 = scmp.lt.s32.totalorder %s197_s0, %s197_s0 }
  0x11   :  { %320 = vmatprep.subr.bf16.mxu0 %v384_v3  ;;  %v354_v50 = vpack.c.bf16 %v118_v49, %v117_v48  ;;  %p361_p0 = scmp.ne.s32.totalorder %s197_s0, %s360_s24  ;;  %p366_p2 = scmp.lt.s32.totalorder %s360_s24, %s360_s24 }
  0x12   :  { %343 = vmatpush3.bf16.msra.mxu1 %v342_v30 }
  0x13   :  { %344 = vmatprep.subr.bf16.mxu1 %v384_v3  ;;  %p367_p3 = por %p366_p2, %p365_p1 }
  0x14   :  { %322 = vmatpush3.bf16.msra.mxu0 %v321_v27 }
  0x15   :  { %323 = vmatprep.subr.bf16.mxu0 %v384_v3  ;;  %p368_p4 = pnand %p367_p3, %p361_p0 }
  0x16   :  { %346 = vmatpush3.bf16.msra.mxu1 %v345_v36 }
  0x17   :  { %347 = vmatprep.subr.bf16.mxu1 %v384_v3 }
  0x18   :  { %325 = vmatpush3.bf16.msra.mxu0 %v324_v33 }
  0x19   :  { %326 = vmatprep.subr.bf16.mxu0 %v384_v3 }
  0x1a   :  { %349 = vmatpush3.bf16.msra.mxu1 %v348_v42 }
  0x1b   :  { %350 = vmatprep.subr.bf16.mxu1 %v384_v3 }
  0x1c   :  { %328 = vmatpush3.bf16.msra.mxu0 %v327_v39 }
  0x1d   :  { %329 = vmatprep.subr.bf16.mxu0 %v384_v3 }
  0x1e   :  { %352 = vmatpush3.bf16.msra.mxu1 %v351_v46 }
  0x1f   :  { %353 = vmatprep.subr.bf16.mxu1 %v384_v3 }
  0x20   :  { %331 = vmatpush3.bf16.msra.mxu0 %v330_v45 }
  0x22   :  { %355 = vmatpush3.bf16.msra.mxu1 %v354_v50 }
  0x23   :  { %271 = vmatmul.mubr.f32.vlgmr.msra.gmra.mrb[0].mxu0 %v15_v47 }
  0xf6   :  { %v98_v51 = vpop.f32.mrb[0].mxu0 }
  0xf7   :  { %v102_v52 = vmax.f32 %v98_v51, 0.0  ;;  %v272_v53 = vpop.f32.mrb[1].mxu0 }
  0xf9   :  { %306 = vmatmul.mubr.f32.vlgmr.msra.gmra.mrb[0].mxu1 %v102_v52 }
 0x1cc   :  { %v185_v54 = vpop.f32.mrb[0].mxu1 }
 0x1cd   :  { %189 = vst [vmem:[#allocation2] sm:$0xff] %v185_v54  ;;  %v307_v55 = vpop.f32.mrb[1].mxu1 }
 0x1ce   :  { %371 = shalt.err (!%p368_p4)
}
 0x1cf   :  { %s372_s26 = scalar_lea.hbm %s538_s3, 128 }
 0x1d0   :  { %p373_p5 = scmp.ne.s32.totalorder %s538_s3, %s372_s26  ;;  %p376_p6 = scmp.lt.u32.totalorder %s372_s26, %s538_s3 }
 0x1d2   :  { %p378_p7 = pnand %p376_p6, %p373_p5 }
 0x1d4   :  { %381 = shalt.err (!%p378_p7)
}
 0x1d5   :  { %199 = dma.vmem_to_hbm [thread:$0]  %s197_s0, 128, %s538_s3, [#allocation3]  }
 0x1d6   :  { %382 = dma.done.wait [#allocation3], 128  }
 0x1d7   :  { %383 = vsyncadd [#allocation3], 4294967168 }
 0x1d8   :  { %203 = vsyncpa [#allocation3], 1 }

</bundles_post_ra>
